<compile_context>
chip_gen: v7x
topology: tpu7x:2x2x1
jax: 0.10.0
libtpu: 0.0.40
codegen_flags: <defaults>
</compile_context>

<pallas_src>
import functools

import jax
import jax.numpy as jnp
import numpy as np
from jax.experimental import pallas as pl
from jax.experimental.pallas import tpu as pltpu

LN_EPS = 1e-6


def _silu(x):
    return x * jax.nn.sigmoid(x)


# ---------------------------------------------------------------------------
# Per-generation sizing (v5e/v6e: 128 MiB VMEM, v7x: 64 MiB per TensorCore).
# ---------------------------------------------------------------------------
def _tpu_vmem_bytes():
    try:
        info = pltpu.get_tpu_info()
        cap = getattr(info, "vmem_capacity_bytes", None)
        if cap:
            return int(cap)
    except Exception:
        pass
    return 128 << 20


_VMEM_BYTES = _tpu_vmem_bytes()
_VMEM_CAP = (_VMEM_BYTES * 3) // 4          # leave headroom for compiler-internal scratch
_BIG_VMEM = _VMEM_BYTES >= (96 << 20)       # v5e/v6e True, v7x False
_TM_CAP = 1024 if _BIG_VMEM else 512        # matmul M-tile cap (multiple of 256)
_TN_CAP = 2048 if _BIG_VMEM else 1024       # readout (no-LN) N-tile cap


def _vmem_limit(need_bytes):
    need = int(need_bytes) + (6 << 20)
    return int(min(max(need, 32 << 20), _VMEM_CAP))


def _pick_tile(dim, cap, mults):
    """Largest tile <= cap.  Prefers exact divisors of `dim` that are multiples of the
    MXU-friendly values in `mults`; falls back to `cap` (cdiv grid, masked partial tile)."""
    if dim <= cap:
        return dim
    for m in mults:
        t = (cap // m) * m
        while t >= m:
            if dim % t == 0:
                return t
            t -= m
    return cap


# ---------------------------------------------------------------------------
# Kernel A: fused  act( LayerNorm( X @ W + bias ) + residual )
# Used for: 1x1 convs (+LN2d +SiLU), shortcut 1x1 conv, residual-add + act3, readout MLP.
# bf16 operands on the MXU, single-pass-LN f32 epilogue.
# ---------------------------------------------------------------------------
def _mm_kernel(*refs, has_bias, has_ln, has_residual, act):
    idx = 0
    x_ref = refs[idx]; idx += 1
    w_ref = refs[idx]; idx += 1
    bias_ref = gamma_ref = beta_ref = res_ref = None
    if has_bias:
        bias_ref = refs[idx]; idx += 1
    if has_ln:
        gamma_ref, beta_ref = refs[idx], refs[idx + 1]; idx += 2
    if has_residual:
        res_ref = refs[idx]; idx += 1
    o_ref = refs[idx]

    acc = jnp.dot(x_ref[...], w_ref[...], preferred_element_type=jnp.float32)
    if has_bias:
        acc = acc + bias_ref[...]
    if has_ln:
        n = acc.shape[-1]
        mean = jnp.sum(acc, axis=-1, keepdims=True) * (1.0 / n)
        msq = jnp.sum(acc * acc, axis=-1, keepdims=True) * (1.0 / n)
        var = jnp.maximum(msq - mean * mean, 0.0)
        acc = (acc - mean) * jax.lax.rsqrt(var + LN_EPS)
        acc = acc * gamma_ref[...] + beta_ref[...]
    if has_residual:
        acc = acc + res_ref[...].astype(jnp.float32)
    if act == "silu":
        acc = _silu(acc)
    o_ref[...] = acc.astype(o_ref.dtype)


def matmul_fused(x, w, *, bias=None, ln=None, residual=None, act="none",
                 out_dtype=jnp.bfloat16):
    """y = act(LN(x @ w + bias) + residual).  x: (M, K), w: (K, N)."""
    M, K = x.shape
    K2, N = w.shape
    assert K == K2

    x = x.astype(jnp.bfloat16)
    w = w.astype(jnp.bfloat16)

    has_bias = bias is not None
    has_ln = ln is not None
    has_residual = residual is not None

    tm = _pick_tile(M, _TM_CAP, (256, 128, 16, 8))
    # LayerNorm normalizes over the full output-channel dim -> N must stay whole there.
    tn = N if has_ln else _pick_tile(N, _TN_CAP, (256, 128))

    # Weight-stationary grid: N outer, M inner -> the (K, tn) weight slab keeps the same
    # block index across the inner M sweep and is not re-fetched.
    grid = (pl.cdiv(N, tn), pl.cdiv(M, tm))

    in_specs = [pl.BlockSpec((tm, K), lambda j, i: (i, 0)),
                pl.BlockSpec((K, tn), lambda j, i: (0, j))]
    args = [x, w]
    if has_bias:
        args.append(bias.reshape(1, N).astype(jnp.float32))
        in_specs.append(pl.BlockSpec((1, tn), lambda j, i: (0, j)))
    if has_ln:
        gamma, beta = ln
        args += [gamma.reshape(1, N).astype(jnp.float32),
                 beta.reshape(1, N).astype(jnp.float32)]
        in_specs += [pl.BlockSpec((1, tn), lambda j, i: (0, j)),
                     pl.BlockSpec((1, tn), lambda j, i: (0, j))]
    if has_residual:
        args.append(residual.astype(jnp.bfloat16))
        in_specs.append(pl.BlockSpec((tm, tn), lambda j, i: (i, j)))

    kernel = functools.partial(_mm_kernel, has_bias=has_bias, has_ln=has_ln,
                               has_residual=has_residual, act=act)

    out_isz = jnp.dtype(out_dtype).itemsize
    need = (2 * tm * K * 2 + 2 * K * tn * 2 + 2 * tm * tn * out_isz
            + (2 * tm * tn * 2 if has_residual else 0)
            + 4 * tm * tn * 4)                  # f32 epilogue temps

    return pl.pallas_call(
        kernel,
        out_shape=jax.ShapeDtypeStruct((M, N), out_dtype),
        grid=grid,
        in_specs=in_specs,
        out_specs=pl.BlockSpec((tm, tn), lambda j, i: (i, j)),
        compiler_params=pltpu.CompilerParams(
            dimension_semantics=("parallel", "parallel"),
            vmem_limit_bytes=_vmem_limit(need)),
    )(*args)


# ---------------------------------------------------------------------------
# Kernel B: depthwise 3x3 conv (pad=1, stride=1, halo fused) + LayerNorm2d + SiLU
#           + fused SE module (global-avg-pool -> FC/SiLU -> FC/sigmoid -> gate).
# ---------------------------------------------------------------------------
def _dw_se_kernel(x_ref, w_ref, gamma_ref, beta_ref,
                  se1w_ref, se1b_ref, se2w_ref, se2b_ref, o_ref, *, H, W):
    C = x_ref.shape[-1]
    x = x_ref[0]                                         # (H, W, C) bf16

    # Halo pad fused in (VMEM-only): build the (H+2, W+2, C) padded image in bf16.
    zc = jnp.zeros((H, 1, C), jnp.bfloat16)
    zr = jnp.zeros((1, W + 2, C), jnp.bfloat16)
    xp = jnp.concatenate([zr, jnp.concatenate([zc, x, zc], axis=1), zr], axis=0)

    w = w_ref[...].astype(jnp.float32)                   # (3, 3, C)
    acc = jnp.zeros((H, W, C), jnp.float32)
    # 3 sublane-shifted bf16 column views, each reused for 3 cheap (major-dim) H shifts;
    # cast to f32 per tap at the multiply, accumulate in f32.
    for dw in range(3):
        col = xp[:, dw:dw + W, :]                        # (H+2, W, C) bf16
        for dh in range(3):
            acc = acc + col[dh:dh + H].astype(jnp.float32) * w[dh, dw][None, None, :]

    # LayerNorm2d over channels (single pass: var = E[x^2] - mean^2) + SiLU, in f32.
    mean = jnp.sum(acc, axis=-1, keepdims=True) * (1.0 / C)
    msq = jnp.sum(acc * acc, axis=-1, keepdims=True) * (1.0 / C)
    var = jnp.maximum(msq - mean * mean, 0.0)
    acc = (acc - mean) * jax.lax.rsqrt(var + LN_EPS)
    acc = acc * gamma_ref[...].astype(jnp.float32) + beta_ref[...].astype(jnp.float32)
    acc = _silu(acc)

    # Fused SE: spatial mean -> FC(SiLU) -> FC(sigmoid) -> channel gate.
    pooled = jnp.mean(acc, axis=(0, 1)).reshape(1, C)
    s = jnp.dot(pooled.astype(jnp.bfloat16), se1w_ref[...],
                preferred_element_type=jnp.float32)
    s = _silu(s + se1b_ref[...])
    g = jnp.dot(s.astype(jnp.bfloat16), se2w_ref[...],
                preferred_element_type=jnp.float32)
    g = jax.nn.sigmoid(g + se2b_ref[...])

    o_ref[...] = (acc * g.reshape(1, 1, C))[None].astype(o_ref.dtype)


def dwconv3x3_ln_silu_se(x, w, gamma, beta, se1_w, se1_b, se2_w, se2_b):
    """x: (B, H, W, C) NHWC; returns SE-gated activation (B, H, W, C) in bf16."""
    B, H, W, C = x.shape
    rd = se1_w.shape[1]
    # TODO(synk): for v7x megacore, split the grid into (B, H-bands) with a two-pass SE
    # (per-band partial sums -> gate) to use both TensorCores when B is small.
    kernel = functools.partial(_dw_se_kernel, H=H, W=W)
    hwc = H * W * C
    need = (2 * 2 * hwc * 2                    # x / out blocks, double-buffered, bf16
            + (H + 2) * (W + 2) * C * 2        # in-kernel padded bf16 image
            + 3 * (H + 2) * W * C * 2          # shifted bf16 column views
            + 4 * hwc * 4                      # f32 accumulator + LN temps
            + 8 * C * rd * 2)                  # SE weights (double-buffered)
    return pl.pallas_call(
        kernel,
        out_shape=jax.ShapeDtypeStruct((B, H, W, C), jnp.bfloat16),
        grid=(B,),
        in_specs=[pl.BlockSpec((1, H, W, C), lambda b: (b, 0, 0, 0)),
                  pl.BlockSpec((3, 3, C), lambda b: (0, 0, 0)),
                  pl.BlockSpec((1, 1, C), lambda b: (0, 0, 0)),
                  pl.BlockSpec((1, 1, C), lambda b: (0, 0, 0)),
                  pl.BlockSpec((C, rd), lambda b: (0, 0)),
                  pl.BlockSpec((1, rd), lambda b: (0, 0)),
                  pl.BlockSpec((rd, C), lambda b: (0, 0)),
                  pl.BlockSpec((1, C), lambda b: (0, 0))],
        out_specs=pl.BlockSpec((1, H, W, C), lambda b: (b, 0, 0, 0)),
        compiler_params=pltpu.CompilerParams(
            dimension_semantics=("parallel",),
            vmem_limit_bytes=_vmem_limit(need)),
    )(x.astype(jnp.bfloat16), w.astype(jnp.bfloat16),
      gamma.reshape(1, 1, C).astype(jnp.float32),
      beta.reshape(1, 1, C).astype(jnp.float32),
      se1_w.astype(jnp.bfloat16), se1_b.reshape(1, rd).astype(jnp.float32),
      se2_w.astype(jnp.bfloat16), se2_b.reshape(1, C).astype(jnp.float32))


# ---------------------------------------------------------------------------
# Kernel C: AdaptiveAvgPool2d as a per-image matmul with an exact 0/1 bf16 pooling
# matrix (f32 accumulate) and exact per-window 1/count f32 scales.
# ---------------------------------------------------------------------------
def _pool_kernel(p_ref, s_ref, x_ref, o_ref):
    acc = jnp.dot(p_ref[...], x_ref[0], preferred_element_type=jnp.float32)
    o_ref[...] = (acc * s_ref[...])[None].astype(o_ref.dtype)


def _build_pool_matrix(H, W, hq, wq):
    """PyTorch AdaptiveAvgPool2d windows (handles non-divisible H/W)."""
    P = np.zeros((hq * wq, H * W), np.float32)
    scale = np.zeros((hq * wq, 1), np.float32)
    for oh in range(hq):
        h0, h1 = (oh * H) // hq, -((-(oh + 1) * H) // hq)
        for ow in range(wq):
            w0, w1 = (ow * W) // wq, -((-(ow + 1) * W) // wq)
            q = oh * wq + ow
            for hh in range(h0, h1):
                P[q, hh * W + w0:hh * W + w1] = 1.0
            scale[q, 0] = 1.0 / float((h1 - h0) * (w1 - w0))
    return jnp.asarray(P, jnp.bfloat16), jnp.asarray(scale, jnp.float32)


def adaptive_avg_pool(x, hq, wq):
    B, H, W, C = x.shape
    P, scale = _build_pool_matrix(H, W, hq, wq)
    Q = hq * wq
    need = 2 * (Q * H * W * 2 + H * W * C * 2 + Q * C * 2) + 2 * Q * C * 4
    out = pl.pallas_call(
        _pool_kernel,
        out_shape=jax.ShapeDtypeStruct((B, Q, C), jnp.bfloat16),
        grid=(B,),
        in_specs=[pl.BlockSpec((Q, H * W), lambda b: (0, 0)),
                  pl.BlockSpec((Q, 1), lambda b: (0, 0)),
                  pl.BlockSpec((1, H * W, C), lambda b: (b, 0, 0))],
        out_specs=pl.BlockSpec((1, Q, C), lambda b: (b, 0, 0)),
        compiler_params=pltpu.CompilerParams(
            dimension_semantics=("parallel",),
            vmem_limit_bytes=_vmem_limit(need)),
    )(P, scale, x.reshape(B, H * W, C).astype(jnp.bfloat16))
    return out.reshape(B, hq, wq, C)


# ---------------------------------------------------------------------------
# RegNet Bottleneck block (timm): conv1x1-LN-SiLU -> dwconv3x3-LN-SiLU -> SE ->
# conv1x1-LN (+ conv1x1-LN shortcut if channels change) -> SiLU
# ---------------------------------------------------------------------------
def bottleneck_block(x, p):
    B, H, W, Cin = x.shape
    Cout = p["conv1_w"].shape[1]
    x_flat = x.reshape(B * H * W, Cin)

    h = matmul_fused(x_flat, p["conv1_w"],
                     ln=(p["conv1_g"], p["conv1_b"]), act="silu")
    h = h.reshape(B, H, W, Cout)

    h = dwconv3x3_ln_silu_se(h, p["conv2_w"], p["conv2_g"], p["conv2_b"],
                             p["se1_w"], p["se1_b"], p["se2_w"], p["se2_b"])

    if "ds_w" in p:
        res = matmul_fused(x_flat, p["ds_w"],
                           ln=(p["ds_g"], p["ds_b"]), act="none")
    else:
        res = x_flat

    out = matmul_fused(h.reshape(B * H * W, Cout), p["conv3_w"],
                       ln=(p["conv3_g"], p["conv3_b"]), residual=res, act="silu")
    return out.reshape(B, H, W, Cout)


def c_abstractor_forward(img_patches, params, num_queries):
    """img_patches: (B, L, vision_dim) -> (B, num_queries, llm_dim)."""
    B, L, D = img_patches.shape
    hw = int(round(L ** 0.5))
    assert hw * hw == L
    # Pos-emb add in bf16 (single cheap XLA pass over the input).
    # TODO(synk): fuse the pos-emb add into the first block's conv1 matmul (per-L-tile
    # extra input block) to remove this HBM round trip entirely.
    # NOTE: eos_tokens (num_eos_tokens=0) and prenorm (False) are disabled by this config.
    x = img_patches.astype(jnp.bfloat16) + params["pos_emb"].astype(jnp.bfloat16)
    x = x.reshape(B, hw, hw, D)                                   # b (h w) d -> b h w d

    for blk in params["s1"]:
        x = bottleneck_block(x, blk)
    hq = int(round(num_queries ** 0.5))
    assert hq * hq == num_queries
    x = adaptive_avg_pool(x, hq, hq)
    for blk in params["s2"]:
        x = bottleneck_block(x, blk)

    Bq, Hq, Wq, C = x.shape
    h = x.reshape(Bq * Hq * Wq, C)                                # b h w d -> (b h w) d
    n_lin = len(params["readout"])
    for i, (w_, b_) in enumerate(params["readout"]):
        is_last = (i == n_lin - 1)
        h = matmul_fused(h, w_, bias=b_,
                         act=("none" if is_last else "silu"),
                         out_dtype=(jnp.float32 if is_last else jnp.bfloat16))
    return h.reshape(Bq, Hq * Wq, -1)


# ---------------------------------------------------------------------------
# Deterministic synthetic parameter init (shapes follow the PyTorch module).
# Matmul / conv / SE weights stored in bf16; LN affines, biases, pos_emb in f32.
# ---------------------------------------------------------------------------
def init_params(key, *, vision_dim, llm_dim, hidden_size, num_input_tokens,
                depth, mlp_depth):
    keys = iter(jax.random.split(key, 512))

    def w(shape, std=0.02, dtype=jnp.bfloat16):
        return (jax.random.normal(next(keys), shape, jnp.float32) * std).astype(dtype)

    def block_params(cin, cout):
        rd = int(round(cin * 0.25))   # se_ratio = 0.25 on block input channels
        p = {
            "conv1_w": w((cin, cout)),
            "conv1_g": jnp.ones((cout,), jnp.float32),
            "conv1_b": jnp.zeros((cout,), jnp.float32),
            "conv2_w": w((3, 3, cout)),
            "conv2_g": jnp.ones((cout,), jnp.float32),
            "conv2_b": jnp.zeros((cout,), jnp.float32),
            "se1_w": w((cout, rd)),
            "se1_b": jnp.zeros((rd,), jnp.float32),
            "se2_w": w((rd, cout)),
            "se2_b": jnp.zeros((cout,), jnp.float32),
            "conv3_w": w((cout, cout)),
            "conv3_g": jnp.ones((cout,), jnp.float32),
            "conv3_b": jnp.zeros((cout,), jnp.float32),
        }
        if cin != cout:
            p["ds_w"] = w((cin, cout))
            p["ds_g"] = jnp.ones((cout,), jnp.float32)
            p["ds_b"] = jnp.zeros((cout,), jnp.float32)
        return p

    readout = [(w((hidden_size, llm_dim)), jnp.zeros((llm_dim,), jnp.float32))]
    for _ in range(1, mlp_depth):
        readout.append((w((llm_dim, llm_dim)), jnp.zeros((llm_dim,), jnp.float32)))

    return {
        "pos_emb": w((1, num_input_tokens, vision_dim), dtype=jnp.float32),
        "s1": [block_params(vision_dim if i == 0 else hidden_size, hidden_size)
               for i in range(depth)],
        "s2": [block_params(hidden_size, hidden_size) for _ in range(depth)],
        "readout": readout,
    }


if __name__ == "__main__":
    # Small demo shapes (module defaults are vision_dim=1024, hidden=1024, llm=4096,
    # L=576, queries=64; scaled down here but structurally identical).
    B = 2
    vision_dim = 32
    llm_dim = 128
    hidden_size = 64          # config.hidden_size (RegNet channel width)
    num_input_tokens = 64     # 8 x 8 patch grid
    num_query_tokens = 16     # 4 x 4 query grid
    depth = 3
    mlp_depth = 2

    key = jax.random.PRNGKey(0)
    k_params, k_x = jax.random.split(key)
    params = init_params(k_params, vision_dim=vision_dim, llm_dim=llm_dim,
                         hidden_size=hidden_size, num_input_tokens=num_input_tokens,
                         depth=depth, mlp_depth=mlp_depth)
    img_patches = jax.random.normal(k_x, (B, num_input_tokens, vision_dim), jnp.float32)

    out = c_abstractor_forward(img_patches, params, num_query_tokens)
    out = jax.block_until_ready(out)
    assert out.shape == (B, num_query_tokens, llm_dim), out.shape
    assert bool(jnp.all(jnp.isfinite(out)))
    print("KERNEL_OK")
</pallas_src>

<mosaic_0001>
module attributes {stable_mosaic.version = 11 : i64} {
  func.func @_mm_kernel(%arg0: i32, %arg1: i32, %arg2: memref<128x32xbf16, #tpu.memory_space<vmem>>, %arg3: memref<32x64xbf16, #tpu.memory_space<vmem>>, %arg4: memref<1x64xf32, #tpu.memory_space<vmem>>, %arg5: memref<1x64xf32, #tpu.memory_space<vmem>>, %arg6: memref<128x64xbf16, #tpu.memory_space<vmem>>) attributes {dimension_semantics = [#tpu.dimension_semantics<parallel>, #tpu.dimension_semantics<parallel>], iteration_bounds = array<i64: 1, 1>, scalar_prefetch = 0 : i64, scratch_operands = 0 : i64, tpu.core_type = #tpu.core_type<tc>, window_params = [{transform_indices = @transform_0, window_bounds = array<i64: 128, 32>}, {transform_indices = @transform_1, window_bounds = array<i64: 32, 64>}, {transform_indices = @transform_2, window_bounds = array<i64: 1, 64>}, {transform_indices = @transform_3, window_bounds = array<i64: 1, 64>}, {transform_indices = @transform_4, window_bounds = array<i64: 128, 64>}]} {
    %c0 = arith.constant 0 : index
    %c0_0 = arith.constant 0 : index
    %0 = vector.load %arg2[%c0, %c0_0] : memref<128x32xbf16, #tpu.memory_space<vmem>>, vector<128x32xbf16>
    %c0_1 = arith.constant 0 : index
    %c0_2 = arith.constant 0 : index
    %1 = vector.load %arg3[%c0_1, %c0_2] : memref<32x64xbf16, #tpu.memory_space<vmem>>, vector<32x64xbf16>
    %cst = arith.constant dense<0.000000e+00> : vector<128x64xf32>
    %2 = tpu.matmul %0, %1, %cst {dimension_numbers = #tpu.dot_dimension_numbers<[1], [0], [0], [1], [0, 0, 1, 1], [], []>} : vector<128x32xbf16>, vector<32x64xbf16>, vector<128x64xf32> -> vector<128x64xf32>
    %cst_3 = arith.constant dense<0.000000e+00> : vector<128xf32>
    %3 = vector.multi_reduction <add>, %2, %cst_3 [1] : vector<128x64xf32> to vector<128xf32>
    %4 = vector.shape_cast %3 : vector<128xf32> to vector<128x1xf32>
    %cst_4 = arith.constant 1.562500e-02 : f32
    %5 = vector.broadcast %cst_4 : f32 to vector<128x1xf32>
    %6 = arith.mulf %4, %5 : vector<128x1xf32>
    %7 = arith.mulf %2, %2 : vector<128x64xf32>
    %cst_5 = arith.constant dense<0.000000e+00> : vector<128xf32>
    %8 = vector.multi_reduction <add>, %7, %cst_5 [1] : vector<128x64xf32> to vector<128xf32>
    %9 = vector.shape_cast %8 : vector<128xf32> to vector<128x1xf32>
    %cst_6 = arith.constant 1.562500e-02 : f32
    %10 = vector.broadcast %cst_6 : f32 to vector<128x1xf32>
    %11 = arith.mulf %9, %10 : vector<128x1xf32>
    %12 = arith.mulf %6, %6 : vector<128x1xf32>
    %13 = arith.subf %11, %12 : vector<128x1xf32>
    %cst_7 = arith.constant 0.000000e+00 : f32
    %14 = vector.broadcast %cst_7 : f32 to vector<128x1xf32>
    %15 = arith.maximumf %13, %14 : vector<128x1xf32>
    %16 = vector.broadcast %6 : vector<128x1xf32> to vector<128x64xf32>
    %17 = arith.subf %2, %16 : vector<128x64xf32>
    %cst_8 = arith.constant 9.99999997E-7 : f32
    %18 = vector.broadcast %cst_8 : f32 to vector<128x1xf32>
    %19 = arith.addf %15, %18 : vector<128x1xf32>
    %20 = math.rsqrt %19 : vector<128x1xf32>
    %21 = vector.broadcast %20 : vector<128x1xf32> to vector<128x64xf32>
    %22 = arith.mulf %17, %21 : vector<128x64xf32>
    %c0_9 = arith.constant 0 : index
    %c0_10 = arith.constant 0 : index
    %23 = vector.load %arg4[%c0_9, %c0_10] : memref<1x64xf32, #tpu.memory_space<vmem>>, vector<1x64xf32>
    %24 = vector.broadcast %23 : vector<1x64xf32> to vector<128x64xf32>
    %25 = arith.mulf %22, %24 : vector<128x64xf32>
    %c0_11 = arith.constant 0 : index
    %c0_12 = arith.constant 0 : index
    %26 = vector.load %arg5[%c0_11, %c0_12] : memref<1x64xf32, #tpu.memory_space<vmem>>, vector<1x64xf32>
    %27 = vector.broadcast %26 : vector<1x64xf32> to vector<128x64xf32>
    %28 = arith.addf %25, %27 : vector<128x64xf32>
    %29 = arith.negf %28 : vector<128x64xf32>
    %30 = math.exp %29 : vector<128x64xf32>
    %cst_13 = arith.constant 1.000000e+00 : f32
    %31 = vector.broadcast %cst_13 : f32 to vector<128x64xf32>
    %32 = arith.addf %31, %30 : vector<128x64xf32>
    %33 = arith.divf %31, %32 : vector<128x64xf32>
    %34 = arith.mulf %28, %33 : vector<128x64xf32>
    %35 = arith.truncf %34 : vector<128x64xf32> to vector<128x64xbf16>
    %c0_14 = arith.constant 0 : index
    %c0_15 = arith.constant 0 : index
    %36 = vector.load %arg6[%c0_14, %c0_15] : memref<128x64xbf16, #tpu.memory_space<vmem>>, vector<128x64xbf16>
    tpu.vector_store %arg6[%c0_14, %c0_15], %35 {strides = array<i32>} : memref<128x64xbf16, #tpu.memory_space<vmem>>, vector<128x64xbf16>,
    return
  }
  func.func @transform_0(%arg0: i32, %arg1: i32) -> (i32, i32) {
    %c0_i32 = arith.constant 0 : i32
    %c0_i32_0 = arith.constant 0 : i32
    return %arg1, %c0_i32 : i32, i32
  }
  func.func @transform_1(%arg0: i32, %arg1: i32) -> (i32, i32) {
    %c0_i32 = arith.constant 0 : i32
    %c0_i32_0 = arith.constant 0 : i32
    return %c0_i32, %arg0 : i32, i32
  }
  func.func @transform_2(%arg0: i32, %arg1: i32) -> (i32, i32) {
    %c0_i32 = arith.constant 0 : i32
    %c0_i32_0 = arith.constant 0 : i32
    return %c0_i32, %arg0 : i32, i32
  }
  func.func @transform_3(%arg0: i32, %arg1: i32) -> (i32, i32) {
    %c0_i32 = arith.constant 0 : i32
    %c0_i32_0 = arith.constant 0 : i32
    return %c0_i32, %arg0 : i32, i32
  }
  func.func @transform_4(%arg0: i32, %arg1: i32) -> (i32, i32) {
    %c0_i32 = arith.constant 0 : i32
    return %arg1, %arg0 : i32, i32
  }
}

</mosaic_0001>

<bundles_post_ra>
// kernel: tpu_custom_call.1
= control target key start
LH: loop header
LB: loop body
LE: loop exit
PB: predicated region body
PF: predicated region fallthrough
CT: control target
= control target key end

     0   :  { %vm90_vm0 = vcmask 261120   ;;  %vm212_vm1 = vcmask 523264   ;;  %vm691_vm2 = vcmask 519168   ;;  %s1349_s1 = inlined_call_operand.vmem [shape: bf16[32,64], index: 1, kind: input, shape index: {}]   ;;  %s1350_s0 = inlined_call_operand.vmem [shape: bf16[128,32], index: 0, kind: input, shape index: {}]   ;;  %s1351_s2 = inlined_call_operand.vmem [shape: f32[1,64], index: 2, kind: input, shape index: {}]   ;;  %s1352_s3 = inlined_call_operand.vmem [shape: f32[1,64], index: 3, kind: input, shape index: {}]   ;;  %s1353_s4 = inlined_call_operand.vmem [shape: bf16[128,64], index: 4, kind: output, shape index: {}]  }
   0x1   :  { %v814_v0 = vld [vmem:[%s1349_s1] sm:$0xff]   ;;  %v815_v1 = vld [vmem:[%s1349_s1 + $0x8] sm:$0xff]   ;;  %v820_v6 = vld [vmem:[%s1350_s0 + $0x10] sm:$0xff]  }
   0x2   :  { %790 = vmatprep.subr.bf16.mxu0 %v814_v0  ;;  %810 = vmatprep.subr.bf16.mxu1 %v814_v0  ;;  %v816_v2 = vld [vmem:[%s1350_s0] sm:$0xff]   ;;  %v818_v4 = vld [vmem:[%s1350_s0 + $0x8] sm:$0xff]   ;;  %v822_v7 = vld [vmem:[%s1350_s0 + $0x30] sm:$0xff]  }
   0x3   :  { %791 = vmatpush3.bf16.msra.mxu0 %v814_v0  ;;  %812 = vmatpush3.bf16.msra.mxu1 %v814_v0  ;;  %v817_v3 = vld [vmem:[%s1350_s0 + $0x20] sm:$0xff]   ;;  %v819_v5 = vld [vmem:[%s1350_s0 + $0x28] sm:$0xff]   ;;  %v821_v8 = vld [vmem:[%s1350_s0 + $0x18] sm:$0xff]  }
   0x4   :  { %792 = vmatprep.subr.bf16.mxu0 %v815_v1  ;;  %811 = vmatprep.subr.bf16.mxu1 %v815_v1  ;;  %v823_v9 = vld [vmem:[%s1350_s0 + $0x38] sm:$0xff]  }
   0x5   :  { %794 = vmatprep.mubr.msk.bf16.mxu0 %vm90_vm0, %v816_v2  ;;  %802 = vmatprep.mubr.msk.bf16.mxu1 %vm90_vm0, %v817_v3 }
   0x7   :  { %793 = vmatpush3.bf16.msra.mxu0 %v815_v1  ;;  %813 = vmatpush3.bf16.msra.mxu1 %v815_v1 }
   0xa   :  { %795 = vmatmul.mubr.msk.bf16.vlgmr.msra.gmra.mrb[0].mxu0 %vm90_vm0, %v818_v4  ;;  %803 = vmatmul.mubr.msk.bf16.vlgmr.msra.gmra.mrb[0].mxu1 %vm90_vm0, %v819_v5 }
   0xb   :  { %798 = vmatprep.mubr.msk.bf16.mxu0 %vm90_vm0, %v820_v6  ;;  %806 = vmatprep.mubr.msk.bf16.mxu1 %vm90_vm0, %v822_v7 }
  0x12   :  { %799 = vmatmul.mubr.msk.bf16.gmra.mrb[4].mxu0 %vm90_vm0, %v821_v8  ;;  %807 = vmatmul.mubr.msk.bf16.gmra.mrb[4].mxu1 %vm90_vm0, %v823_v9 }
  0xdd   :  { %v983_v10 = vpop.f32.mrb[0].mxu0  ;;  %v985_v11 = vpop.f32.mrb[0].mxu1 }
  0xde   :  { %v987_v12 = vpop.f32.mrb[1].mxu0  ;;  %v989_v13 = vpop.f32.mrb[1].mxu1  ;;  %v243_v14 = vsel %vm212_vm1, %v985_v11, 0.0  ;;  %v219_v15 = vsel %vm212_vm1, %v983_v10, 0.0  ;;  %v279_v26 = vmul.f32 %v983_v10, %v983_v10  ;;  %v287_v35 = vmul.f32 %v985_v11, %v985_v11 }
  0xdf   :  { %244 = vadd.xlane.f32.xlu0 %v243_v14  ;;  %v995_v16 = vpop.f32.mrb[2].mxu1  ;;  %220 = vadd.xlane.f32.xlu1 %v219_v15  ;;  %v997_v17 = vpop.f32.mrb[2].mxu0  ;;  %v213_v20 = vsel %vm212_vm1, %v987_v12, 0.0  ;;  %v237_v24 = vsel %vm212_vm1, %v989_v13, 0.0  ;;  %v277_v43 = vmul.f32 %v987_v12, %v987_v12  ;;  %v285_v47 = vmul.f32 %v989_v13, %v989_v13 }
  0xe0   :  { %v999_v18 = vpop.f32.mrb[3].mxu0  ;;  %v1001_v19 = vpop.f32.mrb[3].mxu1  ;;  %v222_v21 = vsel %vm212_vm1, %v997_v17, 0.0  ;;  %v246_v25 = vsel %vm212_vm1, %v995_v16, 0.0  ;;  %v299_v33 = vsel %vm212_vm1, %v279_v26, 0.0  ;;  %v280_v36 = vmul.f32 %v997_v17, %v997_v17 }
  0xe1   :  { %v240_v34 = vsel %vm212_vm1, %v1001_v19, 0.0  ;;  %v323_v37 = vsel %vm212_vm1, %v287_v35, 0.0  ;;  %v288_v39 = vmul.f32 %v995_v16, %v995_v16  ;;  %v216_v41 = vsel %vm212_vm1, %v999_v18, 0.0 }
  0xe2   :  { %v302_v38 = vsel %vm212_vm1, %v280_v36, 0.0  ;;  %v278_v42 = vmul.f32 %v999_v18, %v999_v18  ;;  %v293_v45 = vsel %vm212_vm1, %v277_v43, 0.0  ;;  %v286_v46 = vmul.f32 %v1001_v19, %v1001_v19 }
  0xe3   :  { %214 = vadd.xlane.f32.xlu0 %v213_v20  ;;  %223 = vadd.xlane.f32.xlu1 %v222_v21  ;;  %v326_v40 = vsel %vm212_vm1, %v288_v39, 0.0  ;;  %v317_v49 = vsel %vm212_vm1, %v285_v47, 0.0 }
  0xe4   :  { %v296_v44 = vsel %vm212_vm1, %v278_v42, 0.0  ;;  %v320_v48 = vsel %vm212_vm1, %v286_v46, 0.0 }
  0xe5   :  { %v1007_v22 = vpop.f32.mrb[4].mxu0  ;;  %v1009_v23 = vpop.f32.mrb[4].mxu1 }
  0xe6   :  { %v1017_v27 = vpop.f32.mrb[5].mxu0  ;;  %v1019_v28 = vpop.f32.mrb[5].mxu1  ;;  %v231_v50 = vsel %vm212_vm1, %v1007_v22, 0.0  ;;  %v255_v52 = vsel %vm212_vm1, %v1009_v23, 0.0  ;;  %v283_v58 = vmul.f32 %v1007_v22, %v1007_v22  ;;  %v291_v6 = vmul.f32 %v1009_v23, %v1009_v23 }
  0xe7   :  { %238 = vadd.xlane.f32.xlu0 %v237_v24  ;;  %247 = vadd.xlane.f32.xlu1 %v246_v25  ;;  %v1021_v29 = vpop.f32.mrb[6].mxu0  ;;  %v1023_v30 = vpop.f32.mrb[6].mxu1  ;;  %v225_v54 = vsel %vm212_vm1, %v1017_v27, 0.0  ;;  %v249_v56 = vsel %vm212_vm1, %v1019_v28, 0.0  ;;  %v281_v63 = vmul.f32 %v1017_v27, %v1017_v27  ;;  %v289_v3 = vmul.f32 %v1019_v28, %v1019_v28 }
  0xe8   :  { %v1025_v31 = vpop.f32.mrb[7].mxu0  ;;  %v1027_v32 = vpop.f32.mrb[7].mxu1  ;;  %v234_v51 = vsel %vm212_vm1, %v1021_v29, 0.0  ;;  %v258_v53 = vsel %vm212_vm1, %v1023_v30, 0.0  ;;  %v284_v59 = vmul.f32 %v1021_v29, %v1021_v29  ;;  %v311_v61 = vsel %vm212_vm1, %v283_v58, 0.0 }
  0xe9   :  { %v228_v55 = vsel %vm212_vm1, %v1025_v31, 0.0  ;;  %v252_v57 = vsel %vm212_vm1, %v1027_v32, 0.0  ;;  %v282_v60 = vmul.f32 %v1025_v31, %v1025_v31  ;;  %v290_v0 = vmul.f32 %v1027_v32, %v1027_v32 }
  0xea   :  { %v314_v62 = vsel %vm212_vm1, %v284_v59, 0.0  ;;  %v305_v1 = vsel %vm212_vm1, %v281_v63, 0.0  ;;  %v329_v4 = vsel %vm212_vm1, %v289_v3, 0.0  ;;  %v292_v7 = vmul.f32 %v1023_v30, %v1023_v30 }
  0xeb   :  { %300 = vadd.xlane.f32.xlu0 %v299_v33  ;;  %241 = vadd.xlane.f32.xlu1 %v240_v34  ;;  %v308_v2 = vsel %vm212_vm1, %v282_v60, 0.0  ;;  %v332_v5 = vsel %vm212_vm1, %v290_v0, 0.0  ;;  %v335_v8 = vsel %vm212_vm1, %v291_v6, 0.0 }
  0xec   :  { %v338_v9 = vsel %vm212_vm1, %v292_v7, 0.0 }
  0xef   :  { %324 = vadd.xlane.f32.xlu0 %v323_v37  ;;  %303 = vadd.xlane.f32.xlu1 %v302_v38 }
  0xf3   :  { %327 = vadd.xlane.f32.xlu1 %v326_v40  ;;  %217 = vadd.xlane.f32.xlu0 %v216_v41 }
  0xf7   :  { %297 = vadd.xlane.f32.xlu1 %v296_v44  ;;  %294 = vadd.xlane.f32.xlu0 %v293_v45 }
  0xfb   :  { %321 = vadd.xlane.f32.xlu1 %v320_v48  ;;  %318 = vadd.xlane.f32.xlu0 %v317_v49 }
  0xff   :  { %232 = vadd.xlane.f32.xlu0 %v231_v50  ;;  %235 = vadd.xlane.f32.xlu1 %v234_v51 }
 0x103   :  { %256 = vadd.xlane.f32.xlu0 %v255_v52  ;;  %259 = vadd.xlane.f32.xlu1 %v258_v53 }
 0x107   :  { %226 = vadd.xlane.f32.xlu0 %v225_v54  ;;  %229 = vadd.xlane.f32.xlu1 %v228_v55 }
 0x10b   :  { %250 = vadd.xlane.f32.xlu0 %v249_v56  ;;  %253 = vadd.xlane.f32.xlu1 %v252_v57 }
 0x10f   :  { %312 = vadd.xlane.f32.xlu0 %v311_v61  ;;  %315 = vadd.xlane.f32.xlu1 %v314_v62 }
 0x113   :  { %306 = vadd.xlane.f32.xlu0 %v305_v1  ;;  %309 = vadd.xlane.f32.xlu1 %v308_v2 }
 0x117   :  { %330 = vadd.xlane.f32.xlu0 %v329_v4  ;;  %333 = vadd.xlane.f32.xlu1 %v332_v5 }
 0x11b   :  { %336 = vadd.xlane.f32.xlu0 %v335_v8  ;;  %339 = vadd.xlane.f32.xlu1 %v338_v9 }
 0x16c   :  { %v245_v14 = vpop.xlane.xlu0 %244  ;;  %v221_v15 = vpop.xlane.xlu1 %220 }
 0x16d   :  { %v1095_v26 = vmul.f32 0.015625, %v221_v15  ;;  %v1097_v33 = vmul.f32 0.015625, %v245_v14 }
 0x16f   :  { %v359_v36 = vmul.f32 %v1095_v26, %v1095_v26  ;;  %v367_v40 = vmul.f32 %v1097_v33, %v1097_v33 }
 0x170   :  { %v215_v20 = vpop.xlane.xlu0 %214  ;;  %v224_v21 = vpop.xlane.xlu1 %223 }
 0x171   :  { %v1101_v37 = vmul.f32 0.015625, %v224_v21  ;;  %v1109_v51 = vmul.f32 0.015625, %v215_v20 }
 0x173   :  { %v360_v44 = vmul.f32 %v1101_v37, %v1101_v37  ;;  %v357_v62 = vmul.f32 %v1109_v51, %v1109_v51 }
 0x174   :  { %v239_v24 = vpop.xlane.xlu0 %238  ;;  %v248_v25 = vpop.xlane.xlu1 %247 }
 0x175   :  { %v1105_v41 = vmul.f32 0.015625, %v248_v25  ;;  %v1121_v6 = vmul.f32 0.015625, %v239_v24 }
 0x177   :  { %v368_v52 = vmul.f32 %v1105_v41, %v1105_v41  ;;  %v365_v24 = vmul.f32 %v1121_v6, %v1121_v6 }
 0x178   :  { %v301_v34 = vpop.xlane.xlu0 %300  ;;  %v242_v35 = vpop.xlane.xlu1 %241 }
 0x179   :  { %v343_v38 = vmul.f32 0.015625, %v301_v34  ;;  %v1117_v63 = vmul.f32 0.015625, %v242_v35  ;;  %v407_v35 = vsub.f32 %v983_v10, %v1095_v26  ;;  %v1137_v10 = vld [vmem:[%s1352_s3] ss:$0 sm:$0xff] }
 0x17b   :  { %v375_v39 = vsub.f32 %v343_v38, %v359_v36  ;;  %v366_v14 = vmul.f32 %v1117_v63, %v1117_v63 }
 0x17c   :  { %v325_v42 = vpop.xlane.xlu0 %324  ;;  %v304_v43 = vpop.xlane.xlu1 %303 }
 0x17d   :  { %v391_v45 = vmax.f32 %v375_v39, 0.0  ;;  %v351_v46 = vmul.f32 0.015625, %v325_v42  ;;  %v344_v47 = vmul.f32 0.015625, %v304_v43  ;;  %v1132_v39 = vld [vmem:[%s1351_s2] ss:$0 sm:$0xff] }
 0x17f   :  { %v423_v48 = vadd.f32 1e-06, %v391_v45  ;;  %v383_v49 = vsub.f32 %v351_v46, %v367_v40  ;;  %v376_v50 = vsub.f32 %v344_v47, %v360_v44 }
 0x180   :  { %v328_v53 = vpop.xlane.xlu1 %327  ;;  %v218_v54 = vpop.xlane.xlu0 %217 }
 0x181   :  { %824 = vrsqrt.f32 %v423_v48  ;;  %v399_v55 = vmax.f32 %v383_v49, 0.0  ;;  %v392_v56 = vmax.f32 %v376_v50, 0.0  ;;  %v352_v57 = vmul.f32 0.015625, %v328_v53 }
 0x182   :  { %v1113_v58 = vmul.f32 0.015625, %v218_v54  ;;  %v415_v48 = vsub.f32 %v985_v11, %v1097_v33  ;;  %v408_v53 = vsub.f32 %v997_v17, %v1101_v37  ;;  %v416_v11 = vsub.f32 %v995_v16, %v1105_v41 }
 0x183   :  { %v431_v59 = vadd.f32 1e-06, %v399_v55  ;;  %v424_v60 = vadd.f32 1e-06, %v392_v56  ;;  %v384_v61 = vsub.f32 %v352_v57, %v368_v52 }
 0x184   :  { %v358_v0 = vmul.f32 %v1113_v58, %v1113_v58  ;;  %v298_v1 = vpop.xlane.xlu1 %297  ;;  %v295_v2 = vpop.xlane.xlu0 %294 }
 0x185   :  { %826 = vrsqrt.f32 %v431_v59  ;;  %v400_v3 = vmax.f32 %v384_v61, 0.0  ;;  %v342_v4 = vmul.f32 0.015625, %v298_v1  ;;  %v341_v5 = vmul.f32 0.015625, %v295_v2 }
 0x186   :  { %828 = vrsqrt.f32 %v424_v60 }
 0x187   :  { %v432_v7 = vadd.f32 1e-06, %v400_v3  ;;  %v374_v8 = vsub.f32 %v342_v4, %v358_v0  ;;  %v373_v9 = vsub.f32 %v341_v5, %v357_v62 }
 0x188   :  { %v322_v15 = vpop.xlane.xlu1 %321  ;;  %v319_v20 = vpop.xlane.xlu0 %318 }
 0x189   :  { %830 = vrsqrt.f32 %v432_v7  ;;  %v390_v21 = vmax.f32 %v374_v8, 0.0  ;;  %v389_v25 = vmax.f32 %v373_v9, 0.0  ;;  %v350_v34 = vmul.f32 0.015625, %v322_v15 }
 0x18a   :  { %v349_v36 = vmul.f32 0.015625, %v319_v20  ;;  %v406_v7 = vsub.f32 %v999_v18, %v1113_v58  ;;  %v413_v58 = vsub.f32 %v989_v13, %v1121_v6 }
 0x18b   :  { %v825_v38 = vpop.eup %824  ;;  %v422_v40 = vadd.f32 1e-06, %v390_v21  ;;  %v421_v42 = vadd.f32 1e-06, %v389_v25  ;;  %v382_v43 = vsub.f32 %v350_v34, %v366_v14  ;;  %v405_v14 = vsub.f32 %v987_v12, %v1109_v51 }
 0x18c   :  { %v455_v44 = vmul.f32 %v825_v38, %v407_v35  ;;  %v381_v45 = vsub.f32 %v349_v36, %v365_v24  ;;  %v233_v46 = vpop.xlane.xlu0 %232  ;;  %v236_v47 = vpop.xlane.xlu1 %235  ;;  %v414_v12 = vsub.f32 %v1001_v19, %v1117_v63 }
 0x18d   :  { %832 = vrsqrt.f32 %v422_v40  ;;  %v398_v26 = vmax.f32 %v382_v43, 0.0  ;;  %v1162_v8 = vmul.f32 0.015625, %v233_v46  ;;  %v1167_v20 = vmul.f32 0.015625, %v236_v47 }
 0x18e   :  { %v478_v49 = vmul.f32 %v1132_v39, %v455_v44  ;;  %834 = vrsqrt.f32 %v421_v42  ;;  %v397_v50 = vmax.f32 %v381_v45, 0.0 }
 0x18f   :  { %v827_v52 = vpop.eup %826  ;;  %v430_v54 = vadd.f32 1e-06, %v398_v26  ;;  %v363_v40 = vmul.f32 %v1162_v8, %v1162_v8  ;;  %v364_v13 = vmul.f32 %v1167_v20, %v1167_v20 }
 0x190   :  { %v829_v55 = vpop.eup %828  ;;  %v1145_v56 = vadd.f32 %v1137_v10, %v478_v49  ;;  %v463_v57 = vmul.f32 %v827_v52, %v415_v48  ;;  %v429_v59 = vadd.f32 1e-06, %v397_v50  ;;  %v257_v60 = vpop.xlane.xlu0 %256 }
 0x191   :  { %v260_v61 = vpop.xlane.xlu1 %259  ;;  %v456_v62 = vmul.f32 %v829_v55, %v408_v53  ;;  %836 = vrsqrt.f32 %v430_v54  ;;  %v1187_v6 = vmul.f32 0.015625, %v257_v60 }
 0x192   :  { %v734_v33 = vmul.f32 -1.442695, %v1145_v56  ;;  %v486_v0 = vmul.f32 %v1132_v39, %v463_v57  ;;  %838 = vrsqrt.f32 %v429_v59  ;;  %v1189_v19 = vmul.f32 0.015625, %v260_v61 }
 0x193   :  { %v831_v17 = vpop.eup %830  ;;  %v479_v37 = vmul.f32 %v1132_v39, %v456_v62 }
 0x194   :  { %840 = vpow2.f32 %v734_v33  ;;  %v1153_v1 = vadd.f32 %v1137_v10, %v486_v0  ;;  %v464_v2 = vmul.f32 %v831_v17, %v416_v11  ;;  %v227_v3 = vpop.xlane.xlu0 %226 }
 0x195   :  { %v230_v4 = vpop.xlane.xlu1 %229  ;;  %v1156_v5 = vadd.f32 %v1137_v10, %v479_v37  ;;  %v1172_v35 = vmul.f32 0.015625, %v227_v3 }
 0x196   :  { %v742_v16 = vmul.f32 -1.442695, %v1153_v1  ;;  %v487_v41 = vmul.f32 %v1132_v39, %v464_v2  ;;  %v1182_v42 = vmul.f32 0.015625, %v230_v4 }
 0x197   :  { %v833_v9 = vpop.eup %832  ;;  %v735_v15 = vmul.f32 -1.442695, %v1156_v5  ;;  %v361_v47 = vmul.f32 %v1172_v35, %v1172_v35 }
 0x198   :  { %v835_v21 = vpop.eup %834  ;;  %842 = vpow2.f32 %v742_v16  ;;  %v1170_v25 = vadd.f32 %v1137_v10, %v487_v41  ;;  %v454_v34 = vmul.f32 %v833_v9, %v406_v7  ;;  %v251_v24 = vpop.xlane.xlu0 %250  ;;  %v362_v59 = vmul.f32 %v1182_v42, %v1182_v42 }
 0x199   :  { %v254_v18 = vpop.xlane.xlu1 %253  ;;  %844 = vpow2.f32 %v735_v15  ;;  %v453_v51 = vmul.f32 %v835_v21, %v405_v14  ;;  %v1203_v60 = vmul.f32 0.015625, %v251_v24 }
 0x19a   :  { %v743_v36 = vmul.f32 -1.442695, %v1170_v25  ;;  %v477_v38 = vmul.f32 %v1132_v39, %v454_v34  ;;  %v1210_v17 = vmul.f32 0.015625, %v254_v18 }
 0x19b   :  { %v837_v43 = vpop.eup %836  ;;  %v476_v44 = vmul.f32 %v1132_v39, %v453_v51  ;;  %v369_v18 = vmul.f32 %v1203_v60, %v1203_v60 }
 0x19c   :  { %v839_v63 = vpop.eup %838  ;;  %846 = vpow2.f32 %v743_v36  ;;  %v1192_v45 = vadd.f32 %v1137_v10, %v477_v38  ;;  %v462_v46 = vmul.f32 %v837_v43, %v414_v12  ;;  %v313_v26 = vpop.xlane.xlu0 %312 }
 0x19d   :  { %v316_v48 = vpop.xlane.xlu1 %315  ;;  %v1197_v49 = vadd.f32 %v1137_v10, %v476_v44  ;;  %v461_v50 = vmul.f32 %v839_v63, %v413_v58  ;;  %v347_v52 = vmul.f32 0.015625, %v313_v26 }
 0x19e   :  { %v348_v53 = vmul.f32 0.015625, %v316_v48  ;;  %v841_v54 = vpop.eup %840  ;;  %v733_v55 = vmul.f32 -1.442695, %v1192_v45  ;;  %v485_v57 = vmul.f32 %v1132_v39, %v462_v46  ;;  %v370_v46 = vmul.f32 %v1210_v17, %v1210_v17 }
 0x19f   :  { %v565_v61 = vadd.f32 1.0, %v841_v54  ;;  %v732_v62 = vmul.f32 -1.442695, %v1197_v49  ;;  %v484_v11 = vmul.f32 %v1132_v39, %v461_v50  ;;  %v379_v33 = vsub.f32 %v347_v52, %v363_v40 }
 0x1a0   :  { %848 = vpow2.f32 %v733_v55  ;;  %v1208_v0 = vadd.f32 %v1137_v10, %v485_v57  ;;  %v380_v37 = vsub.f32 %v348_v53, %v364_v13  ;;  %v307_v2 = vpop.xlane.xlu0 %306  ;;  %v371_v53 = vmul.f32 %v1187_v6, %v1187_v6 }
 0x1a1   :  { %v310_v3 = vpop.xlane.xlu1 %309  ;;  %850 = vrcp.f32 %v565_v61  ;;  %v1213_v4 = vadd.f32 %v1137_v10, %v484_v11  ;;  %v395_v16 = vmax.f32 %v379_v33, 0.0  ;;  %v345_v41 = vmul.f32 0.015625, %v307_v2 }
 0x1a2   :  { %v843_v7 = vpop.eup %842  ;;  %852 = vpow2.f32 %v732_v62  ;;  %v741_v9 = vmul.f32 -1.442695, %v1208_v0  ;;  %v396_v14 = vmax.f32 %v380_v37, 0.0  ;;  %v346_v15 = vmul.f32 0.015625, %v310_v3 }
 0x1a3   :  { %v845_v21 = vpop.eup %844  ;;  %v573_v34 = vadd.f32 1.0, %v843_v7  ;;  %v740_v24 = vmul.f32 -1.442695, %v1213_v4  ;;  %v377_v58 = vsub.f32 %v345_v41, %v361_v47  ;;  %v427_v51 = vadd.f32 1e-06, %v395_v16 }
 0x1a4   :  { %v566_v12 = vadd.f32 1.0, %v845_v21  ;;  %854 = vpow2.f32 %v741_v9  ;;  %v378_v36 = vsub.f32 %v346_v15, %v362_v59  ;;  %v331_v38 = vpop.xlane.xlu0 %330  ;;  %v428_v26 = vadd.f32 1e-06, %v396_v14 }
 0x1a5   :  { %v334_v40 = vpop.xlane.xlu1 %333  ;;  %856 = vrcp.f32 %v573_v34  ;;  %v393_v43 = vmax.f32 %v377_v58, 0.0  ;;  %v353_v44 = vmul.f32 0.015625, %v331_v38  ;;  %v372_v37 = vmul.f32 %v1189_v19, %v1189_v19 }
 0x1a6   :  { %v354_v13 = vmul.f32 0.015625, %v334_v40  ;;  %v847_v63 = vpop.eup %846  ;;  %858 = vrcp.f32 %v566_v12  ;;  %v394_v48 = vmax.f32 %v378_v36, 0.0 }
 0x1a7   :  { %v574_v50 = vadd.f32 1.0, %v847_v63  ;;  %860 = vpow2.f32 %v740_v24  ;;  %v425_v47 = vadd.f32 1e-06, %v393_v43  ;;  %v385_v52 = vsub.f32 %v353_v44, %v369_v18 }
 0x1a8   :  { %862 = vrsqrt.f32 %v427_v51  ;;  %v426_v54 = vadd.f32 1e-06, %v394_v48  ;;  %v386_v55 = vsub.f32 %v354_v13, %v370_v46  ;;  %v337_v57 = vpop.xlane.xlu0 %336  ;;  %v411_v63 = vsub.f32 %v1007_v22, %v1162_v8 }
 0x1a9   :  { %v340_v59 = vpop.xlane.xlu1 %339  ;;  %864 = vrcp.f32 %v574_v50  ;;  %v401_v61 = vmax.f32 %v385_v52, 0.0  ;;  %v355_v62 = vmul.f32 0.015625, %v337_v57  ;;  %v412_v52 = vsub.f32 %v1021_v29, %v1167_v20 }
 0x1aa   :  { %v356_v11 = vmul.f32 0.015625, %v340_v59  ;;  %v849_v33 = vpop.eup %848  ;;  %866 = vrsqrt.f32 %v428_v26  ;;  %v402_v2 = vmax.f32 %v386_v55, 0.0  ;;  %v409_v22 = vsub.f32 %v1017_v27, %v1172_v35 }
 0x1ab   :  { %v851_v3 = vpop.eup %850  ;;  %v564_v16 = vadd.f32 1.0, %v849_v33  ;;  %868 = vrsqrt.f32 %v425_v47  ;;  %v433_v41 = vadd.f32 1e-06, %v401_v61  ;;  %v387_v7 = vsub.f32 %v355_v62, %v371_v53 }
 0x1ac   :  { %v853_v9 = vpop.eup %852  ;;  %v613_v14 = vmul.f32 %v851_v3, %v1145_v56  ;;  %870 = vrsqrt.f32 %v426_v54  ;;  %v434_v15 = vadd.f32 1e-06, %v402_v2  ;;  %v388_v21 = vsub.f32 %v356_v11, %v372_v37 }
 0x1ad   :  { %872 = vrcp.f32 %v564_v16  ;;  %v563_v34 = vadd.f32 1.0, %v853_v9  ;;  %v403_v24 = vmax.f32 %v387_v7, 0.0  ;;  %v410_v29 = vsub.f32 %v1025_v31, %v1182_v42 }
 0x1ae   :  { %v855_v18 = vpop.eup %854  ;;  %v766_v58 = vpack.c.bf16 %v613_v14, %v613_v14  ;;  %874 = vrsqrt.f32 %v433_v41  ;;  %v404_v12 = vmax.f32 %v388_v21, 0.0  ;;  %v417_v61 = vsub.f32 %v1019_v28, %v1203_v60 }
 0x1af   :  { %v857_v51 = vpop.eup %856  ;;  %876 = vrcp.f32 %v563_v34  ;;  %v572_v36 = vadd.f32 1.0, %v855_v18  ;;  %v435_v38 = vadd.f32 1e-06, %v403_v24  ;;  %v419_v42 = vsub.f32 %v1009_v23, %v1187_v6 }
 0x1b0   :  { %v859_v40 = vpop.eup %858  ;;  %694 = vst.msk [vmem:[%s1353_s4 + $0x8] sm:$0xf] %vm691_vm2, %v766_v58  ;;  %v621_v56 = vmul.f32 %v857_v51, %v1153_v1  ;;  %878 = vrsqrt.f32 %v434_v15  ;;  %v436_v43 = vadd.f32 1e-06, %v404_v12  ;;  %v420_v28 = vsub.f32 %v1023_v30, %v1189_v19 }
 0x1b1   :  { %v861_v44 = vpop.eup %860  ;;  %v614_v13 = vmul.f32 %v859_v40, %v1156_v5  ;;  %880 = vrcp.f32 %v572_v36  ;;  %v418_v23 = vsub.f32 %v1027_v32, %v1210_v17 }
 0x1b2   :  { %v863_v46 = vpop.eup %862  ;;  %v774_v26 = vpack.c.bf16 %v621_v56, %v621_v56  ;;  %v571_v48 = vadd.f32 1.0, %v861_v44  ;;  %882 = vrsqrt.f32 %v435_v38 }
 0x1b3   :  { %v865_v50 = vpop.eup %864  ;;  %v767_v47 = vpack.c.bf16 %v614_v13, %v614_v13  ;;  %v459_v53 = vmul.f32 %v863_v46, %v411_v63  ;;  %884 = vrsqrt.f32 %v436_v43 }
 0x1b4   :  { %v867_v1 = vpop.eup %866  ;;  %702 = vst.msk [vmem:[%s1353_s4 + $0x28] sm:$0xf] %vm691_vm2, %v774_v26  ;;  %v622_v5 = vmul.f32 %v865_v50, %v1170_v25  ;;  %886 = vrcp.f32 %v571_v48 }
 0x1b5   :  { %v869_v8 = vpop.eup %868  ;;  %695 = vst.msk [vmem:[%s1353_s4 + $0xc] sm:$0xf] %vm691_vm2, %v767_v47  ;;  %v482_v20 = vmul.f32 %v1132_v39, %v459_v53  ;;  %v460_v54 = vmul.f32 %v867_v1, %v412_v52 }
 0x1b6   :  { %v871_v55 = vpop.eup %870  ;;  %v775_v57 = vpack.c.bf16 %v622_v5, %v622_v5  ;;  %v457_v59 = vmul.f32 %v869_v8, %v409_v22 }
 0x1b7   :  { %v873_v25 = vpop.eup %872  ;;  %v1253_v27 = vadd.f32 %v1137_v10, %v482_v20  ;;  %v483_v35 = vmul.f32 %v1132_v39, %v460_v54  ;;  %v458_v62 = vmul.f32 %v871_v55, %v410_v29 }
 0x1b8   :  { %v875_v11 = vpop.eup %874  ;;  %703 = vst.msk [vmem:[%s1353_s4 + $0x2c] sm:$0xf] %vm691_vm2, %v775_v57  ;;  %v612_v31 = vmul.f32 %v873_v25, %v1192_v45  ;;  %v480_v60 = vmul.f32 %v1132_v39, %v457_v59 }
 0x1b9   :  { %v877_v33 = vpop.eup %876  ;;  %v738_v37 = vmul.f32 -1.442695, %v1253_v27  ;;  %v1268_v2 = vadd.f32 %v1137_v10, %v483_v35  ;;  %v481_v3 = vmul.f32 %v1132_v39, %v458_v62  ;;  %v465_v16 = vmul.f32 %v875_v11, %v417_v61 }
 0x1ba   :  { %v879_v41 = vpop.eup %878  ;;  %v765_v7 = vpack.c.bf16 %v612_v31, %v612_v31  ;;  %v611_v45 = vmul.f32 %v877_v33, %v1197_v49  ;;  %v1275_v30 = vadd.f32 %v1137_v10, %v480_v60 }
 0x1bb   :  { %v881_v6 = vpop.eup %880  ;;  %888 = vpow2.f32 %v738_v37  ;;  %v739_v19 = vmul.f32 -1.442695, %v1268_v2  ;;  %v1279_v9 = vadd.f32 %v1137_v10, %v481_v3  ;;  %v488_v14 = vmul.f32 %v1132_v39, %v465_v16 }
 0x1bc   :  { %v883_v15 = vpop.eup %882  ;;  %693 = vst.msk [vmem:[%s1353_s4 + $0x4] sm:$0xf] %vm691_vm2, %v765_v7  ;;  %v764_v49 = vpack.c.bf16 %v611_v45, %v611_v45  ;;  %v620_v32 = vmul.f32 %v881_v6, %v1208_v0  ;;  %v736_v17 = vmul.f32 -1.442695, %v1275_v30  ;;  %v466_v21 = vmul.f32 %v879_v41, %v418_v23 }
 0x1bd   :  { %v885_v34 = vpop.eup %884  ;;  %890 = vpow2.f32 %v739_v19  ;;  %v737_v24 = vmul.f32 -1.442695, %v1279_v9  ;;  %v1290_v18 = vadd.f32 %v1137_v10, %v488_v14  ;;  %v467_v58 = vmul.f32 %v883_v15, %v419_v42 }
 0x1be   :  { %v887_v12 = vpop.eup %886  ;;  %692 = vst.msk [vmem:[%s1353_s4] sm:$0xf] %vm691_vm2, %v764_v49  ;;  %v773_v51 = vpack.c.bf16 %v620_v32, %v620_v32  ;;  %892 = vpow2.f32 %v736_v17  ;;  %v489_v0 = vmul.f32 %v1132_v39, %v466_v21  ;;  %v468_v36 = vmul.f32 %v885_v34, %v420_v28 }
 0x1bf   :  { %v619_v38 = vmul.f32 %v887_v12, %v1213_v4  ;;  %894 = vpow2.f32 %v737_v24  ;;  %v744_v40 = vmul.f32 -1.442695, %v1290_v18  ;;  %v490_v56 = vmul.f32 %v1132_v39, %v467_v58 }
 0x1c0   :  { %701 = vst.msk [vmem:[%s1353_s4 + $0x24] sm:$0xf] %vm691_vm2, %v773_v51  ;;  %v512_v43 = vadd.f32 %v1137_v10, %v489_v0  ;;  %v491_v44 = vmul.f32 %v1132_v39, %v468_v36 }
 0x1c1   :  { %v772_v13 = vpack.c.bf16 %v619_v38, %v619_v38  ;;  %896 = vpow2.f32 %v744_v40  ;;  %v513_v63 = vadd.f32 %v1137_v10, %v490_v56 }
 0x1c2   :  { %v745_v46 = vmul.f32 -1.442695, %v512_v43  ;;  %v514_v4 = vadd.f32 %v1137_v10, %v491_v44 }
 0x1c3   :  { %700 = vst.msk [vmem:[%s1353_s4 + $0x20] sm:$0xf] %vm691_vm2, %v772_v13  ;;  %v746_v26 = vmul.f32 -1.442695, %v513_v63 }
 0x1c4   :  { %898 = vpow2.f32 %v745_v46  ;;  %v747_v48 = vmul.f32 -1.442695, %v514_v4 }
 0x1c5   :  { %v889_v50 = vpop.eup %888  ;;  %900 = vpow2.f32 %v746_v26 }
 0x1c6   :  { %v569_v47 = vadd.f32 1.0, %v889_v50  ;;  %902 = vpow2.f32 %v747_v48 }
 0x1c7   :  { %v891_v39 = vpop.eup %890 }
 0x1c8   :  { %v893_v52 = vpop.eup %892  ;;  %904 = vrcp.f32 %v569_v47  ;;  %v570_v53 = vadd.f32 1.0, %v891_v39 }
 0x1c9   :  { %v895_v1 = vpop.eup %894  ;;  %v567_v5 = vadd.f32 1.0, %v893_v52 }
 0x1ca   :  { %906 = vrcp.f32 %v570_v53  ;;  %v568_v10 = vadd.f32 1.0, %v895_v1 }
 0x1cb   :  { %v897_v22 = vpop.eup %896  ;;  %908 = vrcp.f32 %v567_v5 }
 0x1cc   :  { %910 = vrcp.f32 %v568_v10  ;;  %v575_v8 = vadd.f32 1.0, %v897_v22 }
 0x1ce   :  { %v899_v29 = vpop.eup %898  ;;  %912 = vrcp.f32 %v575_v8 }
 0x1cf   :  { %v901_v20 = vpop.eup %900  ;;  %v576_v54 = vadd.f32 1.0, %v899_v29 }
 0x1d0   :  { %v903_v55 = vpop.eup %902  ;;  %v577_v57 = vadd.f32 1.0, %v901_v20 }
 0x1d1   :  { %914 = vrcp.f32 %v576_v54  ;;  %v578_v59 = vadd.f32 1.0, %v903_v55 }
 0x1d2   :  { %v905_v25 = vpop.eup %904  ;;  %916 = vrcp.f32 %v577_v57 }
 0x1d3   :  { %v617_v61 = vmul.f32 %v905_v25, %v1253_v27  ;;  %918 = vrcp.f32 %v578_v59 }
 0x1d4   :  { %v907_v35 = vpop.eup %906 }
 0x1d5   :  { %v909_v62 = vpop.eup %908  ;;  %v770_v11 = vpack.c.bf16 %v617_v61, %v617_v61  ;;  %v618_v31 = vmul.f32 %v907_v35, %v1268_v2 }
 0x1d6   :  { %v911_v42 = vpop.eup %910  ;;  %v615_v28 = vmul.f32 %v909_v62, %v1275_v30 }
 0x1d7   :  { %698 = vst.msk [vmem:[%s1353_s4 + $0x18] sm:$0xf] %vm691_vm2, %v770_v11  ;;  %v771_v60 = vpack.c.bf16 %v618_v31, %v618_v31  ;;  %v616_v33 = vmul.f32 %v911_v42, %v1279_v9 }
 0x1d8   :  { %v913_v37 = vpop.eup %912  ;;  %v768_v3 = vpack.c.bf16 %v615_v28, %v615_v28 }
 0x1d9   :  { %699 = vst.msk [vmem:[%s1353_s4 + $0x1c] sm:$0xf] %vm691_vm2, %v771_v60  ;;  %v769_v27 = vpack.c.bf16 %v616_v33, %v616_v33  ;;  %v623_v2 = vmul.f32 %v913_v37, %v1290_v18 }
 0x1da   :  { %696 = vst.msk [vmem:[%s1353_s4 + $0x10] sm:$0xf] %vm691_vm2, %v768_v3 }
 0x1db   :  { %v915_v16 = vpop.eup %914  ;;  %697 = vst.msk [vmem:[%s1353_s4 + $0x14] sm:$0xf] %vm691_vm2, %v769_v27  ;;  %v776_v41 = vpack.c.bf16 %v623_v2, %v623_v2 }
 0x1dc   :  { %v917_v7 = vpop.eup %916  ;;  %v624_v45 = vmul.f32 %v915_v16, %v512_v43 }
 0x1dd   :  { %v919_v23 = vpop.eup %918  ;;  %704 = vst.msk [vmem:[%s1353_s4 + $0x30] sm:$0xf] %vm691_vm2, %v776_v41  ;;  %v625_v30 = vmul.f32 %v917_v7, %v513_v63 }
 0x1de   :  { %v777_v6 = vpack.c.bf16 %v624_v45, %v624_v45  ;;  %v626_v19 = vmul.f32 %v919_v23, %v514_v4 }
 0x1df   :  { %v778_v9 = vpack.c.bf16 %v625_v30, %v625_v30 }
 0x1e0   :  { %705 = vst.msk [vmem:[%s1353_s4 + $0x34] sm:$0xf] %vm691_vm2, %v777_v6  ;;  %v779_v14 = vpack.c.bf16 %v626_v19, %v626_v19 }
 0x1e1   :  { %706 = vst.msk [vmem:[%s1353_s4 + $0x38] sm:$0xf] %vm691_vm2, %v778_v9 }
 0x1e2   :  { %707 = vst.msk [vmem:[%s1353_s4 + $0x3c] sm:$0xf] %vm691_vm2, %v779_v14 }

</bundles_post_ra>
